<compile_context>
chip_gen: v5e
topology: v5e:2x2
jax: 0.10.0
libtpu: 0.0.40
codegen_flags: <defaults>
</compile_context>

<pallas_src>
import functools

import jax
import jax.numpy as jnp
from jax.experimental import pallas as pl
from jax.experimental.pallas import tpu as pltpu

_MARGIN = 0.01  # hard-coded 0.01 in the reference forward (not self.margin)


def _dwl_kernel(x_tile_ref, x_full_ref, g_ref, tcol_ref, trow_ref, out_ref,
                *, n_valid, tm):
    """One row tile: sim block, positive sampling, masked negative reduction."""
    i = pl.program_id(0)
    n_pad = x_full_ref.shape[0]

    # sim tile = X_tile @ X_full.T (contract feature dim of both operands; MXU,
    # f32 accumulation; operands keep their input dtype -- no f32 upcast).
    sim = jax.lax.dot_general(
        x_tile_ref[...], x_full_ref[...],
        (((1,), (1,)), ((), ())),
        preferred_element_type=jnp.float32,
    )  # (tm, n_pad) f32

    col = jax.lax.broadcasted_iota(jnp.int32, (tm, n_pad), 1)
    row = jax.lax.broadcasted_iota(jnp.int32, (tm, n_pad), 0) + i * tm
    valid_col = col < n_valid

    same = tcol_ref[...] == trow_ref[...]                 # (tm, n_pad)
    pos = same & (col != row) & valid_col                 # positives, no diagonal
    neg = jnp.logical_not(same) & valid_col               # negatives

    # Sample one positive per row with prob ∝ exp(5*sim) via Gumbel-max.
    neg_inf = jnp.float32(-jnp.inf)
    key = jnp.where(pos, 5.0 * sim + g_ref[...], neg_inf)
    key_max = jnp.max(key, axis=1, keepdims=True)         # (tm, 1)
    has_pos = key_max > neg_inf                           # guard rows w/o positives
    pos_sample = jnp.max(jnp.where(key == key_max, sim, neg_inf),
                         axis=1, keepdims=True)           # sim of sampled positive

    # Negatives above (sampled_pos - margin): mean(neg) - sampled_pos + margin.
    sel = neg & (sim > pos_sample - _MARGIN)
    cnt = jnp.sum(sel.astype(jnp.float32), axis=1, keepdims=True)
    ssum = jnp.sum(jnp.where(sel, sim, 0.0), axis=1, keepdims=True)

    row_valid = (jax.lax.broadcasted_iota(jnp.int32, (tm, 1), 0) + i * tm) < n_valid
    contrib = jnp.where(
        row_valid & has_pos & (cnt > 0.0),
        ssum / jnp.maximum(cnt, 1.0) - pos_sample + _MARGIN,
        0.0,
    )  # (tm, 1)
    partial = jnp.sum(contrib)  # scalar partial loss sum for this row tile

    # Lane-dense (8, 128) output slab: partial at [0, 0], zeros elsewhere, so the
    # wrapper reduction is simply a sum over the whole output array.
    r = jax.lax.broadcasted_iota(jnp.int32, (8, 128), 0)
    c = jax.lax.broadcasted_iota(jnp.int32, (8, 128), 1)
    out_ref[...] = jnp.where((r == 0) & (c == 0), partial, 0.0)


def dist_weight_loss(inputs, targets, *, rng_key=None, gumbel=None, tm=None):
    """Pallas TPU implementation of DistWeightLoss.forward. Returns a scalar."""
    n, d = inputs.shape

    # Row tile: multiple of 8, sized so ~10 live (tm, n) f32 slabs fit a
    # conservative VMEM budget (safe on v7x's 64 MiB physical VMEM).
    n8 = ((n + 7) // 8) * 8
    if tm is None:
        budget = 24 * 1024 * 1024
        tm = max(8, min(256, (budget // (10 * 4 * max(n8, 128))) // 8 * 8))
    tm = min(int(tm), n8)
    num_tiles = pl.cdiv(n, tm)
    n_pad = num_tiles * tm

    x = inputs
    t = targets.astype(jnp.int32)
    if n_pad != n:
        x = jnp.pad(x, ((0, n_pad - n), (0, 0)))
        t = jnp.pad(t, (0, n_pad - n), constant_values=-1)
    t_col = t.reshape(n_pad, 1)
    t_row = t.reshape(1, n_pad)

    if gumbel is None:
        if rng_key is None:
            rng_key = jax.random.PRNGKey(0)
        gumbel = jax.random.gumbel(rng_key, (n_pad, n_pad), dtype=jnp.float32)
    else:
        gumbel = jnp.asarray(gumbel, jnp.float32)
        gumbel = jnp.pad(gumbel, ((0, n_pad - gumbel.shape[0]),
                                  (0, n_pad - gumbel.shape[1])))

    kernel = functools.partial(_dwl_kernel, n_valid=n, tm=tm)

    itemsize = jnp.dtype(x.dtype).itemsize
    vmem_limit = int(min(
        48 * 1024 * 1024,
        max(16 * 1024 * 1024,
            10 * tm * n_pad * 4                # sim/key/mask slabs + gumbel bufs
            + n_pad * d * itemsize             # resident full X
            + 4 * tm * d * itemsize            # double-buffered X row tiles
            + (1 << 20)),
    ))

    out = pl.pallas_call(
        kernel,
        grid=(num_tiles,),
        out_shape=jax.ShapeDtypeStruct((num_tiles * 8, 128), jnp.float32),
        in_specs=[
            pl.BlockSpec((tm, d), lambda i: (i, 0)),       # X row tile (streamed)
            pl.BlockSpec((n_pad, d), lambda i: (0, 0)),    # full X (resident)
            pl.BlockSpec((tm, n_pad), lambda i: (i, 0)),   # gumbel row tile
            pl.BlockSpec((tm, 1), lambda i: (i, 0)),       # labels (column view)
            pl.BlockSpec((1, n_pad), lambda i: (0, 0)),    # labels (row view)
        ],
        out_specs=pl.BlockSpec((8, 128), lambda i: (i, 0)),
        compiler_params=pltpu.CompilerParams(
            dimension_semantics=("parallel",),
            vmem_limit_bytes=vmem_limit,
        ),
        cost_estimate=pl.CostEstimate(
            flops=2 * n_pad * n_pad * d,
            transcendentals=0,
            bytes_accessed=n_pad * n_pad * 4 + 2 * n_pad * d * itemsize,
        ),
    )(x, x, gumbel, t_col, t_row)

    # Each tile wrote its partial sum at one position, zeros elsewhere.
    return jnp.sum(out) / n


def _reference(inputs, targets, gumbel):
    """Pure-JAX reference (same Gumbel noise) for a correctness check."""
    n = inputs.shape[0]
    xf = inputs.astype(jnp.float32)
    sim = jnp.matmul(xf, xf.T, precision=jax.lax.Precision.HIGHEST)
    t = targets.astype(jnp.int32).reshape(n, 1)
    same = t == t.T
    eye = jnp.eye(n, dtype=bool)
    pos = same & ~eye
    neg = ~same
    key = jnp.where(pos, 5.0 * sim + gumbel[:n, :n], -jnp.inf)
    key_max = key.max(axis=1, keepdims=True)
    has_pos = key_max > -jnp.inf
    pos_sample = jnp.where(key == key_max, sim, -jnp.inf).max(axis=1, keepdims=True)
    sel = neg & (sim > pos_sample - _MARGIN)
    cnt = sel.sum(axis=1, keepdims=True).astype(jnp.float32)
    ssum = jnp.where(sel, sim, 0.0).sum(axis=1, keepdims=True)
    contrib = jnp.where(has_pos & (cnt > 0),
                        ssum / jnp.maximum(cnt, 1.0) - pos_sample + _MARGIN, 0.0)
    return jnp.sum(contrib) / n


if __name__ == "__main__":
    # Small shapes consistent with the module: N samples of D-dim embeddings,
    # 2 classes x 4 instances each (so every row has 3 positives, 4 negatives).
    N, D = 8, 32
    key0 = jax.random.PRNGKey(0)
    kx, kg = jax.random.split(key0)
    x = jax.random.normal(kx, (N, D), dtype=jnp.float32)
    x = x / jnp.linalg.norm(x, axis=1, keepdims=True)   # typical embedding norm
    targets = jnp.array([0, 0, 0, 0, 1, 1, 1, 1], dtype=jnp.int32)

    gumbel = jax.random.gumbel(kg, (N, N), dtype=jnp.float32)

    loss = dist_weight_loss(x, targets, gumbel=gumbel)
    jax.block_until_ready(loss)

    ref = _reference(x, targets, gumbel)
    jax.block_until_ready(ref)
    assert abs(float(loss) - float(ref)) < 1e-3 * max(1.0, abs(float(ref))), (
        float(loss), float(ref))

    print("KERNEL_OK")
</pallas_src>

<mosaic_0001>
module attributes {stable_mosaic.version = 11 : i64} {
  func.func @_dwl_kernel(%arg0: i32, %arg1: memref<8x32xf32, #tpu.memory_space<vmem>>, %arg2: memref<8x32xf32, #tpu.memory_space<vmem>>, %arg3: memref<8x8xf32, #tpu.memory_space<vmem>>, %arg4: memref<8x1xi32, #tpu.memory_space<vmem>>, %arg5: memref<1x8xi32, #tpu.memory_space<vmem>>, %arg6: memref<8x128xf32, #tpu.memory_space<vmem>>) attributes {dimension_semantics = [#tpu.dimension_semantics<parallel>], iteration_bounds = array<i64: 1>, scalar_prefetch = 0 : i64, scratch_operands = 0 : i64, tpu.core_type = #tpu.core_type<tc>, window_params = [{transform_indices = @transform_0, window_bounds = array<i64: 8, 32>}, {pipeline_mode = #tpu.pipeline_mode<synchronous>, transform_indices = @transform_1, window_bounds = array<i64: 8, 32>}, {transform_indices = @transform_2, window_bounds = array<i64: 8, 8>}, {transform_indices = @transform_3, window_bounds = array<i64: 8, 1>}, {pipeline_mode = #tpu.pipeline_mode<synchronous>, transform_indices = @transform_4, window_bounds = array<i64: 1, 8>}, {transform_indices = @transform_5, window_bounds = array<i64: 8, 128>}]} {
    %c0 = arith.constant 0 : index
    %c0_0 = arith.constant 0 : index
    %0 = vector.load %arg1[%c0, %c0_0] : memref<8x32xf32, #tpu.memory_space<vmem>>, vector<8x32xf32>
    %c0_1 = arith.constant 0 : index
    %c0_2 = arith.constant 0 : index
    %1 = vector.load %arg2[%c0_1, %c0_2] : memref<8x32xf32, #tpu.memory_space<vmem>>, vector<8x32xf32>
    %cst = arith.constant dense<0.000000e+00> : vector<8x8xf32>
    %2 = tpu.matmul %0, %1, %cst {dimension_numbers = #tpu.dot_dimension_numbers<[1], [1], [0], [0], [0, 0, 1, 0], [], []>} : vector<8x32xf32>, vector<8x32xf32>, vector<8x8xf32> -> vector<8x8xf32>
    %3 = tpu.iota {dimensions = array<i32: 1>} : vector<8x8xi32>
    %4 = tpu.iota {dimensions = array<i32: 0>} : vector<8x8xi32>
    %c8_i32 = arith.constant 8 : i32
    %5 = arith.muli %arg0, %c8_i32 : i32
    %6 = vector.broadcast %5 : i32 to vector<8x8xi32>
    %7 = arith.addi %4, %6 : vector<8x8xi32>
    %c8_i32_3 = arith.constant 8 : i32
    %8 = vector.broadcast %c8_i32_3 : i32 to vector<8x8xi32>
    %9 = arith.cmpi slt, %3, %8 : vector<8x8xi32>
    %c0_4 = arith.constant 0 : index
    %c0_5 = arith.constant 0 : index
    %10 = vector.load %arg4[%c0_4, %c0_5] : memref<8x1xi32, #tpu.memory_space<vmem>>, vector<8x1xi32>
    %c0_6 = arith.constant 0 : index
    %c0_7 = arith.constant 0 : index
    %11 = vector.load %arg5[%c0_6, %c0_7] : memref<1x8xi32, #tpu.memory_space<vmem>>, vector<1x8xi32>
    %12 = vector.broadcast %10 : vector<8x1xi32> to vector<8x8xi32>
    %13 = vector.broadcast %11 : vector<1x8xi32> to vector<8x8xi32>
    %14 = arith.cmpi eq, %12, %13 : vector<8x8xi32>
    %15 = arith.cmpi ne, %3, %7 : vector<8x8xi32>
    %16 = arith.andi %14, %15 : vector<8x8xi1>
    %17 = arith.andi %16, %9 : vector<8x8xi1>
    %cst_8 = arith.constant dense<true> : vector<8x8xi1>
    %18 = arith.xori %14, %cst_8 : vector<8x8xi1>
    %19 = arith.andi %18, %9 : vector<8x8xi1>
    %cst_9 = arith.constant 5.000000e+00 : f32
    %20 = vector.broadcast %cst_9 : f32 to vector<8x8xf32>
    %21 = arith.mulf %20, %2 : vector<8x8xf32>
    %c0_10 = arith.constant 0 : index
    %c0_11 = arith.constant 0 : index
    %22 = vector.load %arg3[%c0_10, %c0_11] : memref<8x8xf32, #tpu.memory_space<vmem>>, vector<8x8xf32>
    %23 = arith.addf %21, %22 : vector<8x8xf32>
    %cst_12 = arith.constant 0xFF800000 : f32
    %24 = vector.broadcast %cst_12 : f32 to vector<8x8xf32>
    %25 = arith.select %17, %23, %24 : vector<8x8xi1>, vector<8x8xf32>
    %cst_13 = arith.constant dense<0xFF800000> : vector<8xf32>
    %26 = vector.multi_reduction <maximumf>, %25, %cst_13 [1] : vector<8x8xf32> to vector<8xf32>
    %27 = vector.shape_cast %26 : vector<8xf32> to vector<8x1xf32>
    %cst_14 = arith.constant 0xFF800000 : f32
    %28 = vector.broadcast %cst_14 : f32 to vector<8x1xf32>
    %29 = arith.cmpf ogt, %27, %28 : vector<8x1xf32>
    %30 = vector.broadcast %27 : vector<8x1xf32> to vector<8x8xf32>
    %31 = arith.cmpf oeq, %25, %30 : vector<8x8xf32>
    %cst_15 = arith.constant 0xFF800000 : f32
    %32 = vector.broadcast %cst_15 : f32 to vector<8x8xf32>
    %33 = arith.select %31, %2, %32 : vector<8x8xi1>, vector<8x8xf32>
    %cst_16 = arith.constant dense<0xFF800000> : vector<8xf32>
    %34 = vector.multi_reduction <maximumf>, %33, %cst_16 [1] : vector<8x8xf32> to vector<8xf32>
    %35 = vector.shape_cast %34 : vector<8xf32> to vector<8x1xf32>
    %cst_17 = arith.constant 0.00999999977 : f32
    %36 = vector.broadcast %cst_17 : f32 to vector<8x1xf32>
    %37 = arith.subf %35, %36 : vector<8x1xf32>
    %38 = vector.broadcast %37 : vector<8x1xf32> to vector<8x8xf32>
    %39 = arith.cmpf ogt, %2, %38 : vector<8x8xf32>
    %40 = arith.andi %19, %39 : vector<8x8xi1>
    %41 = arith.extui %40 : vector<8x8xi1> to vector<8x8xi32>
    %42 = arith.sitofp %41 : vector<8x8xi32> to vector<8x8xf32>
    %cst_18 = arith.constant dense<0.000000e+00> : vector<8xf32>
    %43 = vector.multi_reduction <add>, %42, %cst_18 [1] : vector<8x8xf32> to vector<8xf32>
    %44 = vector.shape_cast %43 : vector<8xf32> to vector<8x1xf32>
    %cst_19 = arith.constant 0.000000e+00 : f32
    %45 = vector.broadcast %cst_19 : f32 to vector<8x8xf32>
    %46 = arith.select %40, %2, %45 : vector<8x8xi1>, vector<8x8xf32>
    %cst_20 = arith.constant dense<0.000000e+00> : vector<8xf32>
    %47 = vector.multi_reduction <add>, %46, %cst_20 [1] : vector<8x8xf32> to vector<8xf32>
    %48 = vector.shape_cast %47 : vector<8xf32> to vector<8x1xf32>
    %49 = tpu.iota {dimensions = array<i32: 0>} : vector<8x1xi32>
    %c8_i32_21 = arith.constant 8 : i32
    %50 = arith.muli %arg0, %c8_i32_21 : i32
    %51 = vector.broadcast %50 : i32 to vector<8x1xi32>
    %52 = arith.addi %49, %51 : vector<8x1xi32>
    %c8_i32_22 = arith.constant 8 : i32
    %53 = vector.broadcast %c8_i32_22 : i32 to vector<8x1xi32>
    %54 = arith.cmpi slt, %52, %53 : vector<8x1xi32>
    %55 = arith.andi %54, %29 : vector<8x1xi1>
    %cst_23 = arith.constant 0.000000e+00 : f32
    %56 = vector.broadcast %cst_23 : f32 to vector<8x1xf32>
    %57 = arith.cmpf ogt, %44, %56 : vector<8x1xf32>
    %58 = arith.andi %55, %57 : vector<8x1xi1>
    %cst_24 = arith.constant 1.000000e+00 : f32
    %59 = vector.broadcast %cst_24 : f32 to vector<8x1xf32>
    %60 = arith.maximumf %44, %59 : vector<8x1xf32>
    %61 = arith.divf %48, %60 : vector<8x1xf32>
    %62 = arith.subf %61, %35 : vector<8x1xf32>
    %cst_25 = arith.constant 0.00999999977 : f32
    %63 = vector.broadcast %cst_25 : f32 to vector<8x1xf32>
    %64 = arith.addf %62, %63 : vector<8x1xf32>
    %cst_26 = arith.constant 0.000000e+00 : f32
    %65 = vector.broadcast %cst_26 : f32 to vector<8x1xf32>
    %66 = arith.select %58, %64, %65 : vector<8x1xi1>, vector<8x1xf32>
    %67 = vector.shape_cast %66 : vector<8x1xf32> to vector<1x8x1xf32>
    %cst_27 = arith.constant dense<0.000000e+00> : vector<1xf32>
    %68 = vector.multi_reduction <add>, %67, %cst_27 [1, 2] : vector<1x8x1xf32> to vector<1xf32>
    %69 = vector.shape_cast %68 : vector<1xf32> to vector<1x1x1xf32>
    %70 = vector.extract %69[0, 0, 0] : f32 from vector<1x1x1xf32>
    %71 = tpu.iota {dimensions = array<i32: 0>} : vector<8x128xi32>
    %72 = tpu.iota {dimensions = array<i32: 1>} : vector<8x128xi32>
    %c0_i32 = arith.constant 0 : i32
    %73 = vector.broadcast %c0_i32 : i32 to vector<8x128xi32>
    %74 = arith.cmpi eq, %71, %73 : vector<8x128xi32>
    %c0_i32_28 = arith.constant 0 : i32
    %75 = vector.broadcast %c0_i32_28 : i32 to vector<8x128xi32>
    %76 = arith.cmpi eq, %72, %75 : vector<8x128xi32>
    %77 = arith.andi %74, %76 : vector<8x128xi1>
    %cst_29 = arith.constant 0.000000e+00 : f32
    %78 = vector.broadcast %70 : f32 to vector<8x128xf32>
    %79 = vector.broadcast %cst_29 : f32 to vector<8x128xf32>
    %80 = arith.select %77, %78, %79 : vector<8x128xi1>, vector<8x128xf32>
    %c0_30 = arith.constant 0 : index
    %c0_31 = arith.constant 0 : index
    %81 = vector.load %arg6[%c0_30, %c0_31] : memref<8x128xf32, #tpu.memory_space<vmem>>, vector<8x128xf32>
    tpu.vector_store %arg6[%c0_30, %c0_31], %80 {strides = array<i32>} : memref<8x128xf32, #tpu.memory_space<vmem>>, vector<8x128xf32>,
    return
  }
  func.func @transform_0(%arg0: i32) -> (i32, i32) {
    %c0_i32 = arith.constant 0 : i32
    %c0_i32_0 = arith.constant 0 : i32
    return %arg0, %c0_i32 : i32, i32
  }
  func.func @transform_1(%arg0: i32) -> (i32, i32) {
    %c0_i32 = arith.constant 0 : i32
    %c0_i32_0 = arith.constant 0 : i32
    %c0_i32_1 = arith.constant 0 : i32
    return %c0_i32, %c0_i32_0 : i32, i32
  }
  func.func @transform_2(%arg0: i32) -> (i32, i32) {
    %c0_i32 = arith.constant 0 : i32
    %c0_i32_0 = arith.constant 0 : i32
    return %arg0, %c0_i32 : i32, i32
  }
  func.func @transform_3(%arg0: i32) -> (i32, i32) {
    %c0_i32 = arith.constant 0 : i32
    %c0_i32_0 = arith.constant 0 : i32
    return %arg0, %c0_i32 : i32, i32
  }
  func.func @transform_4(%arg0: i32) -> (i32, i32) {
    %c0_i32 = arith.constant 0 : i32
    %c0_i32_0 = arith.constant 0 : i32
    %c0_i32_1 = arith.constant 0 : i32
    return %c0_i32, %c0_i32_0 : i32, i32
  }
  func.func @transform_5(%arg0: i32) -> (i32, i32) {
    %c0_i32 = arith.constant 0 : i32
    %c0_i32_0 = arith.constant 0 : i32
    return %arg0, %c0_i32 : i32, i32
  }
}

</mosaic_0001>

<bundles_post_ra>
// kernel: tpu_custom_call.1
= control target key start
LH: loop header
LB: loop body
LE: loop exit
PB: predicated region body
PF: predicated region fallthrough
CT: control target
= control target key end

     0   :  { %10 = vsyncpa [#allocation3], 0  ;;  %s349_s0 = inlined_call_operand.vmem [shape: f32[8,32], index: 0, kind: input, shape index: {}]   ;;  %s350_s1 = inlined_call_operand.hbm [shape: f32[8,32], index: 1, kind: input, shape index: {}]   ;;  %s351_s2 = inlined_call_operand.hbm [shape: f32[8,8], index: 2, kind: input, shape index: {}]   ;;  %s352_s3 = inlined_call_operand.vmem [shape: s32[8,1], index: 3, kind: input, shape index: {}]   ;;  %s353_s4 = inlined_call_operand.vmem [shape: s32[1,8], index: 4, kind: input, shape index: {}]   ;;  %s354_s5 = inlined_call_operand.hbm [shape: f32[8,128], index: 5, kind: output, shape index: {}]  }
   0x1   :  { %11 = vsyncpa [#allocation6], 0 }
   0x2   :  { %12 = vsyncpa [#allocation4], 0  ;;  %s20_s20 = sshll.u32 %s350_s1, 4  ;;  %s276_s21 = smov [#allocation2]   ;;  %s21_s20 = int_to_ptr.hbm [resolvable:$true] %s20_s20 }
   0x3   :  { %s22_s22 = sshll.u32 %s276_s21, 4  ;;  %s31_s25 = sshll.u32 %s351_s2, 4  ;;  %s23_s22 = int_to_ptr.vmem [resolvable:$true] %s22_s22  ;;  %s32_s25 = int_to_ptr.hbm [resolvable:$true] %s31_s25 }
   0x4   :  { %25 = dma.hbm_to_vmem [thread:$0]  %s21_s20, 128, %s23_s22, [#allocation3]  }
   0x5   :  { %s277_s26 = smov [#allocation5]  }
   0x6   :  { %s33_s27 = sshll.u32 %s277_s26, 4  ;;  %s34_s27 = int_to_ptr.vmem [resolvable:$true] %s33_s27 }
   0x7   :  { %36 = dma.hbm_to_vmem [thread:$0]  %s32_s25, 128, %s34_s27, [#allocation6]  }
   0x8   :  { %270 = dma.done.wait [#allocation3], 128  }
   0x9   :  { %271 = vsyncadd [#allocation3], 4294967168 }
   0xa   :  { %272 = dma.done.wait [#allocation6], 128  }
   0xb   :  { %273 = vsyncadd [#allocation6], 4294967168  ;;  %v278_v0 = vmov 0   ;;  %vm51_vm0 = vcmask 261120   ;;  %v50_v1 = vld [vmem:[#allocation2] sm:$0xff]  ;;  %v78_v4 = vlaneseq  ;;  %vm279_vm3 = vmmov 1  }
   0xc   :  { %194 = vset.pattern.permute.xlu0 %v278_v0  ;;  %v86_v2 = vld [vmem:[%s352_s3] sm:$0xff]  ;;  %182 = vmatpush.xpose.msk.msra.mxu0 %vm51_vm0, %v50_v1  ;;  %v99_v11 = vld [vmem:[#allocation5] sm:$0xff]  ;;  %vm102_vm9 = vcmask 64512   ;;  %v280_v22 = vmov 0.0   ;;  %s171_s8 = sshll.u32 %s354_s5, 4  ;;  %s172_s8 = int_to_ptr.hbm [resolvable:$true] %s171_s8 }
   0xd   :  { %v49_v3 = vld [vmem:[%s349_s0] sm:$0xff]  ;;  %89 = vperm.xlu0 %194, %v86_v2   ;;  %v324_v5 = vand.u32 127, %v78_v4  ;;  %v334_v9 = vshrl.u32 %v78_v4, 7  ;;  %s281_s0 = smov [#allocation7]  }
   0xe   :  { %v195_v6 = vld [vmem:[%s353_s4] ss:$0 sm:$0xff]  ;;  %s169_s3 = sshll.u32 %s281_s0, 4  ;;  %s170_s3 = int_to_ptr.vmem [resolvable:$true] %s169_s3 }
   0xf   :  { %183 = vmatmul.msk.f32.vlgmr.msra.gmra.mxu0 %vm51_vm0, %v49_v3  ;;  %vm85_vm1 = vcmp.lt.s32.totalorder %v324_v5, 8  ;;  %vm93_vm6 = vcmp.ne.s32.totalorder %v324_v5, %v334_v9 }
  0x7f   :  { %v90_v7 = vpop.permute.xlu0 %89 }
  0x80   :  { %vm92_vm2 = vcmp.eq.s32.totalorder %v90_v7, %v195_v6 }
  0x81   :  { %vm96_vm4 = vmxor %vm92_vm2, %vm279_vm3  ;;  %vm147_vm3 = vcmask 7168  }
  0x82   :  { %vm330_vm5 = vmand %vm96_vm4, %vm85_vm1 }
  0x83   :  { %vm94_vm7 = vmand %vm92_vm2, %vm93_vm6  ;;  %vm159_vm6 = vcmp.eq.s32.totalorder %v324_v5, 0 }
  0x84   :  { %vm95_vm8 = vmand %vm94_vm7, %vm85_vm1 }
  0x8c   :  { %v75_v10 = vpop.f32.mrf.mxu0 }
  0x8d   :  { %v98_v12 = vmul.f32 5.0, %v75_v10 }
  0x8f   :  { %v100_v13 = vadd.f32 %v99_v11, %v98_v12 }
  0x91   :  { %v101_v14 = vsel %vm95_vm8, %v100_v13, -inf }
  0x92   :  { %v103_v15 = vsel %vm102_vm9, %v101_v14, -inf }
  0x93   :  { %104 = vmax.xlane.f32.xlu0 %v103_v15 }
 0x106   :  { %v105_v16 = vpop.xlane.xlu0 %104 }
 0x107   :  { %vm107_vm10 = vcmp.eq.f32.partialorder %v101_v14, %v105_v16  ;;  %vm106_vm2 = vcmp.gt.f32.partialorder %v105_v16, -inf }
 0x108   :  { %v108_v17 = vsel %vm107_vm10, %v75_v10, -inf }
 0x109   :  { %v109_v18 = vsel %vm102_vm9, %v108_v17, -inf }
 0x10a   :  { %110 = vmax.xlane.f32.xlu1 %v109_v18 }
 0x17d   :  { %v111_v19 = vpop.xlane.xlu1 %110 }
 0x17e   :  { %v184_v20 = vadd.f32 -0.01, %v111_v19 }
 0x180   :  { %vm113_vm11 = vcmp.gt.f32.partialorder %v75_v10, %v184_v20 }
 0x181   :  { %vm114_vm12 = vmand %vm330_vm5, %vm113_vm11  ;;  %vm158_vm5 = vcmp.eq.s32.totalorder %v334_v9, 0 }
 0x182   :  { %v120_v21 = vsel %vm114_vm12, %v75_v10, 0.0  ;;  %v185_v23 = vsel %vm114_vm12, 1.0, %v280_v22  ;;  %vm160_vm7 = vmand %vm158_vm5, %vm159_vm6 }
 0x183   :  { %v121_v24 = vsel %vm102_vm9, %v120_v21, 0.0  ;;  %v117_v25 = vsel %vm102_vm9, %v185_v23, 0.0 }
 0x184   :  { %122 = vadd.xlane.f32.xlu2 %v121_v24  ;;  %118 = vadd.xlane.f32.xlu1 %v117_v25 }
 0x1f7   :  { %v119_v26 = vpop.xlane.xlu1 %118  ;;  %v123_v37 = vpop.xlane.xlu2 %122 }
 0x1f8   :  { %v128_v27 = vmax.f32 %v119_v26, 1.0  ;;  %vm126_vm1 = vcmp.gt.f32.partialorder %v119_v26, 0.0 }
 0x1f9   :  { %vm127_vm4 = vmand %vm106_vm2, %vm126_vm1 }
 0x1fa   :  { %196 = vrcp.f32 %v128_v27  ;;  %v140_v31 = vand.u32 2147483648, %v128_v27  ;;  %v138_v33 = vand.u32 2147483647, %v128_v27  ;;  %vm134_vm14 = vweird.f32 %v128_v27 }
 0x1fc   :  { %v141_v35 = vor.u32 1.1754944e-38, %v140_v31  ;;  %vm139_vm0 = vcmp.eq.f32.partialorder %v138_v33, 8.507059e+37 }
 0x200   :  { %v197_v28 = vpop.eup %196 }
 0x201   :  { %v130_v29 = vmul.f32 %v197_v28, %v128_v27  ;;  %vm135_vm13 = vweird.f32 %v197_v28 }
 0x202   :  { %vm136_vm15 = vmor %vm134_vm14, %vm135_vm13 }
 0x203   :  { %v131_v30 = vsub.f32 1.0, %v130_v29 }
 0x205   :  { %v132_v32 = vmul.f32 %v197_v28, %v131_v30 }
 0x207   :  { %v133_v34 = vadd.f32 %v197_v28, %v132_v32 }
 0x209   :  { %v137_v36 = vsel %vm136_vm15, %v197_v28, %v133_v34 }
 0x20a   :  { %v142_v38 = vsel %vm139_vm0, %v141_v35, %v137_v36 }
 0x20b   :  { %v143_v39 = vmul.f32 %v142_v38, %v123_v37 }
 0x20d   :  { %v144_v40 = vsub.f32 %v143_v39, %v111_v19 }
 0x20f   :  { %v145_v41 = vadd.f32 0.01, %v144_v40 }
 0x211   :  { %v146_v42 = vsel %vm127_vm4, %v145_v41, 0.0 }
 0x212   :  { %v148_v43 = vsel %vm147_vm3, %v146_v42, 0.0 }
 0x213   :  { %149 = vadd.xlane.f32.xlu2 %v148_v43 }
 0x286   :  { %v150_v44 = vpop.xlane.xlu2 %149 }
 0x287   :  { %v151_v45 = vrot.slane %v150_v44, 4 }
 0x289   :  { %v152_v46 = vadd.f32 %v151_v45, %v150_v44 }
 0x28b   :  { %v153_v47 = vrot.slane %v152_v46, 2 }
 0x28d   :  { %v154_v48 = vadd.f32 %v153_v47, %v152_v46 }
 0x28f   :  { %v155_v49 = vrot.slane %v154_v48, 1 }
 0x291   :  { %v156_v50 = vadd.f32 %v155_v49, %v154_v48 }
 0x293   :  { %186 = vpush %v156_v50 }
 0x2c4   :  { %s187_s9 = spop %186 }
 0x2c5   :  { %v161_v51 = vstv %s187_s9 }
 0x2c6   :  { %v162_v52 = vsel %vm160_vm7, %v161_v51, 0.0 }
 0x2c7   :  { %163 = vst [vmem:[#allocation7] sm:$0xff] %v162_v52 }
 0x2c8   :  { %174 = dma.vmem_to_hbm [thread:$0]  %s170_s3, 128, %s172_s8, [#allocation4]  }
 0x2c9   :  { %274 = dma.done.wait [#allocation4], 128  }
 0x2ca   :  { %275 = vsyncadd [#allocation4], 4294967168 }
 0x2cb   :  { %179 = vsyncpa [#allocation3], 1 }
 0x2cc   :  { %180 = vsyncpa [#allocation6], 1 }
 0x2cd   :  { %181 = vsyncpa [#allocation4], 1 }

</bundles_post_ra>
